<compile_context>
chip_gen: v5e
topology: v5e:2x2
jax: 0.10.0
libtpu: 0.0.40
codegen_flags: <defaults>
</compile_context>

<pallas_src>
import functools

import jax
import jax.numpy as jnp
from jax.experimental import pallas as pl
from jax.experimental.pallas import tpu as pltpu


def _pair_to_seq_kernel(x_ref, w_ref, invd_ref, csum_ref, b_ref, o_ref, *, eps):
    # x_ref:    (TM, D) tile of flattened pairwise rows (input dtype)
    # w_ref:    (D, H)  folded weight  gamma[:, None] * W.T   (resident, compute dtype)
    # invd_ref: (D, 1)  column of 1/D (f32)                   (resident)
    # csum_ref: (1, H)  colsum of the folded, cast weight (f32, resident)
    # b_ref:    (1, H)  folded bias  beta @ W.T (f32, resident)
    # o_ref:    (TM, H) output tile
    x = x_ref[...]
    xf = x.astype(jnp.float32)

    # MXU: skinny main matmul on the *raw* tile (bf16 fast path when input is bf16).
    xw = jnp.dot(x, w_ref[...], preferred_element_type=jnp.float32)        # (TM, H)

    # MXU: row statistics (replaces XLU lane reductions); f32 accumulation.
    mean = jnp.dot(xf, invd_ref[...], preferred_element_type=jnp.float32)  # (TM, 1)
    msq = jnp.dot(xf * xf, invd_ref[...], preferred_element_type=jnp.float32)  # (TM, 1)

    var = jnp.maximum(msq - mean * mean, 0.0)
    inv = jax.lax.rsqrt(var + eps)                                          # (TM, 1)

    # Post-matmul LayerNorm: inv_std * (x@W' - mean*colsum(W')) + b'
    out = inv * (xw - mean * csum_ref[...]) + b_ref[...]
    # TODO(synk): for H < 128 a lane-dense (rows*H/128, 128) output layout would
    # convert the masked vst.msk stores into full-width stores; skipped because
    # the required in-kernel (TM, H) -> (TM*H/128, 128) relayout risks Mosaic
    # reshape-lowering issues and the masked stores already hide under the
    # input DMA after this refactor.
    o_ref[...] = out.astype(o_ref.dtype)


def pair_to_sequence(pairwise_state, gamma, beta, weight, *, eps=1e-5, tile_m=2048):
    """pairwise_state: (B, L, L, D); gamma/beta: (D,); weight: (H, D) torch-style.

    Returns pairwise_bias: (B, L, L, H), same dtype as pairwise_state.
    """
    assert pairwise_state.ndim == 4
    B, L1, L2, D = pairwise_state.shape
    H = weight.shape[0]
    assert weight.shape == (H, D)
    assert gamma.shape == (D,) and beta.shape == (D,)

    rows = B * L1 * L2
    x2d = pairwise_state.reshape(rows, D)  # free (metadata-only) collapse

    # Fold the LayerNorm affine into the linear weight (exact algebra); cast
    # resident operands ONCE here.  bf16 activations -> bf16 weight (native MXU
    # fast path); statistics and corrections stay in f32.
    compute_dtype = (
        jnp.bfloat16 if pairwise_state.dtype == jnp.bfloat16 else jnp.float32
    )
    w_t = weight.T.astype(jnp.float32)                                # (D, H)
    w_folded = (gamma.astype(jnp.float32)[:, None] * w_t).astype(compute_dtype)
    # colsum of the weight *as used in the matmul* -> exact mean cancellation.
    csum = jnp.sum(w_folded.astype(jnp.float32), axis=0).reshape(1, H)
    b_folded = (beta.astype(jnp.float32) @ w_t).reshape(1, H).astype(jnp.float32)
    invd = jnp.full((D, 1), 1.0 / D, dtype=jnp.float32)

    # Tile sizing: big row tiles (mem-bound), sublane-aligned (multiple of 8),
    # clamped so small problems still produce >= 2 grid steps (v7x megacore).
    tm = min(int(tile_m), rows)
    if rows >= 16:
        tm = min(tm, max(8, (rows // 2) // 8 * 8))
    tm = max(8, (tm // 8) * 8)
    grid = (pl.cdiv(rows, tm),)  # partial final block handled/masked by Pallas

    in_item = pairwise_state.dtype.itemsize
    out_item = pairwise_state.dtype.itemsize
    cost = pl.CostEstimate(
        flops=2 * rows * D * (H + 2),
        transcendentals=rows,
        bytes_accessed=rows * D * in_item + rows * H * out_item + D * (H + 1) * 4,
    )

    kernel = functools.partial(_pair_to_seq_kernel, eps=float(eps))

    out2d = pl.pallas_call(
        kernel,
        out_shape=jax.ShapeDtypeStruct((rows, H), pairwise_state.dtype),
        grid_spec=pltpu.PrefetchScalarGridSpec(
            num_scalar_prefetch=0,
            grid=grid,
            in_specs=[
                pl.BlockSpec((tm, D), lambda i: (i, 0)),   # x tile
                pl.BlockSpec((D, H), lambda i: (0, 0)),    # folded weight (resident)
                pl.BlockSpec((D, 1), lambda i: (0, 0)),    # 1/D column (resident)
                pl.BlockSpec((1, H), lambda i: (0, 0)),    # colsum(W') (resident)
                pl.BlockSpec((1, H), lambda i: (0, 0)),    # folded bias (resident)
            ],
            out_specs=pl.BlockSpec((tm, H), lambda i: (i, 0)),
        ),
        compiler_params=pltpu.CompilerParams(
            # 1-D parallel grid -> v7x megacore shards the row loop across TCs.
            dimension_semantics=("parallel",),
        ),
        cost_estimate=cost,
    )(x2d, w_folded, invd, csum, b_folded)

    return out2d.reshape(B, L1, L2, H)


def _reference(pairwise_state, gamma, beta, weight, eps=1e-5):
    x = pairwise_state.astype(jnp.float32)
    mean = jnp.mean(x, axis=-1, keepdims=True)
    var = jnp.mean((x - mean) ** 2, axis=-1, keepdims=True)
    z = (x - mean) / jnp.sqrt(var + eps) * gamma.astype(jnp.float32) + beta.astype(
        jnp.float32
    )
    return jnp.einsum(
        "blmd,hd->blmh",
        z,
        weight.astype(jnp.float32),
        precision=jax.lax.Precision.HIGHEST,
    )


if __name__ == "__main__":
    # Small shapes consistent with the module's forward:
    #   pairwise_state: B x L x L x pairwise_state_dim, output B x L x L x num_heads
    B, L, D, H = 2, 8, 32, 8

    key = jax.random.PRNGKey(0)
    k_x, k_g, k_b, k_w = jax.random.split(key, 4)

    pairwise_state = jax.random.normal(k_x, (B, L, L, D), dtype=jnp.float32)
    # Deterministic synthetic parameters (not a checkpoint load).
    gamma = 1.0 + 0.1 * jax.random.normal(k_g, (D,), dtype=jnp.float32)
    beta = 0.1 * jax.random.normal(k_b, (D,), dtype=jnp.float32)
    weight = jax.random.normal(k_w, (H, D), dtype=jnp.float32) / jnp.sqrt(D)

    # f32 path: rows = 128 -> tile clamped to 64 so the parallel grid has 2 steps.
    out = pair_to_sequence(pairwise_state, gamma, beta, weight)
    out = jax.block_until_ready(out)
    ref = _reference(pairwise_state, gamma, beta, weight)
    assert out.shape == (B, L, L, H), out.shape
    assert jnp.allclose(out, ref, atol=2e-4, rtol=2e-4), float(
        jnp.max(jnp.abs(out - ref))
    )

    # bf16 path with a ragged final block (rows=576, tile_m=256 -> grid=3, last
    # block has 64 valid rows; no wrapper-side padding anywhere).
    Bb, Lb = 1, 24
    kb = jax.random.split(key, 2)[1]
    x_bf16 = jax.random.normal(kb, (Bb, Lb, Lb, D), dtype=jnp.float32).astype(
        jnp.bfloat16
    )
    out_bf16 = pair_to_sequence(x_bf16, gamma, beta, weight, tile_m=256)
    out_bf16 = jax.block_until_ready(out_bf16)
    ref_bf16 = _reference(x_bf16, gamma, beta, weight)
    assert out_bf16.shape == (Bb, Lb, Lb, H), out_bf16.shape
    assert jnp.allclose(
        out_bf16.astype(jnp.float32), ref_bf16, atol=5e-2, rtol=5e-2
    ), float(jnp.max(jnp.abs(out_bf16.astype(jnp.float32) - ref_bf16)))

    print("KERNEL_OK")
</pallas_src>

<mosaic_0001>
module attributes {stable_mosaic.version = 11 : i64} {
  func.func @_pair_to_seq_kernel(%arg0: i32, %arg1: memref<64x32xf32, #tpu.memory_space<vmem>>, %arg2: memref<32x8xf32, #tpu.memory_space<vmem>>, %arg3: memref<32x1xf32, #tpu.memory_space<vmem>>, %arg4: memref<1x8xf32, #tpu.memory_space<vmem>>, %arg5: memref<1x8xf32, #tpu.memory_space<vmem>>, %arg6: memref<64x8xf32, #tpu.memory_space<vmem>>) attributes {dimension_semantics = [#tpu.dimension_semantics<parallel>], iteration_bounds = array<i64: 2>, scalar_prefetch = 0 : i64, scratch_operands = 0 : i64, tpu.core_type = #tpu.core_type<tc>, window_params = [{transform_indices = @transform_0, window_bounds = array<i64: 64, 32>}, {pipeline_mode = #tpu.pipeline_mode<synchronous>, transform_indices = @transform_1, window_bounds = array<i64: 32, 8>}, {pipeline_mode = #tpu.pipeline_mode<synchronous>, transform_indices = @transform_2, window_bounds = array<i64: 32, 1>}, {pipeline_mode = #tpu.pipeline_mode<synchronous>, transform_indices = @transform_3, window_bounds = array<i64: 1, 8>}, {pipeline_mode = #tpu.pipeline_mode<synchronous>, transform_indices = @transform_4, window_bounds = array<i64: 1, 8>}, {transform_indices = @transform_5, window_bounds = array<i64: 64, 8>}]} {
    %c0 = arith.constant 0 : index
    %c0_0 = arith.constant 0 : index
    %0 = vector.load %arg1[%c0, %c0_0] : memref<64x32xf32, #tpu.memory_space<vmem>>, vector<64x32xf32>
    %c0_1 = arith.constant 0 : index
    %c0_2 = arith.constant 0 : index
    %1 = vector.load %arg2[%c0_1, %c0_2] : memref<32x8xf32, #tpu.memory_space<vmem>>, vector<32x8xf32>
    %cst = arith.constant dense<0.000000e+00> : vector<64x8xf32>
    %2 = tpu.matmul %0, %1, %cst {dimension_numbers = #tpu.dot_dimension_numbers<[1], [0], [0], [1], [0, 0, 1, 1], [], []>} : vector<64x32xf32>, vector<32x8xf32>, vector<64x8xf32> -> vector<64x8xf32>
    %c0_3 = arith.constant 0 : index
    %c0_4 = arith.constant 0 : index
    %3 = vector.load %arg3[%c0_3, %c0_4] : memref<32x1xf32, #tpu.memory_space<vmem>>, vector<32x1xf32>
    %cst_5 = arith.constant dense<0.000000e+00> : vector<64x1xf32>
    %4 = tpu.matmul %0, %3, %cst_5 {dimension_numbers = #tpu.dot_dimension_numbers<[1], [0], [0], [1], [0, 0, 1, 1], [], []>} : vector<64x32xf32>, vector<32x1xf32>, vector<64x1xf32> -> vector<64x1xf32>
    %5 = arith.mulf %0, %0 : vector<64x32xf32>
    %c0_6 = arith.constant 0 : index
    %c0_7 = arith.constant 0 : index
    %6 = vector.load %arg3[%c0_6, %c0_7] : memref<32x1xf32, #tpu.memory_space<vmem>>, vector<32x1xf32>
    %cst_8 = arith.constant dense<0.000000e+00> : vector<64x1xf32>
    %7 = tpu.matmul %5, %6, %cst_8 {dimension_numbers = #tpu.dot_dimension_numbers<[1], [0], [0], [1], [0, 0, 1, 1], [], []>} : vector<64x32xf32>, vector<32x1xf32>, vector<64x1xf32> -> vector<64x1xf32>
    %8 = arith.mulf %4, %4 : vector<64x1xf32>
    %9 = arith.subf %7, %8 : vector<64x1xf32>
    %cst_9 = arith.constant 0.000000e+00 : f32
    %10 = vector.broadcast %cst_9 : f32 to vector<64x1xf32>
    %11 = arith.maximumf %9, %10 : vector<64x1xf32>
    %cst_10 = arith.constant 9.99999974E-6 : f32
    %12 = vector.broadcast %cst_10 : f32 to vector<64x1xf32>
    %13 = arith.addf %11, %12 : vector<64x1xf32>
    %14 = math.rsqrt %13 : vector<64x1xf32>
    %c0_11 = arith.constant 0 : index
    %c0_12 = arith.constant 0 : index
    %15 = vector.load %arg4[%c0_11, %c0_12] : memref<1x8xf32, #tpu.memory_space<vmem>>, vector<1x8xf32>
    %16 = vector.broadcast %4 : vector<64x1xf32> to vector<64x8xf32>
    %17 = vector.broadcast %15 : vector<1x8xf32> to vector<64x8xf32>
    %18 = arith.mulf %16, %17 : vector<64x8xf32>
    %19 = arith.subf %2, %18 : vector<64x8xf32>
    %20 = vector.broadcast %14 : vector<64x1xf32> to vector<64x8xf32>
    %21 = arith.mulf %20, %19 : vector<64x8xf32>
    %c0_13 = arith.constant 0 : index
    %c0_14 = arith.constant 0 : index
    %22 = vector.load %arg5[%c0_13, %c0_14] : memref<1x8xf32, #tpu.memory_space<vmem>>, vector<1x8xf32>
    %23 = vector.broadcast %22 : vector<1x8xf32> to vector<64x8xf32>
    %24 = arith.addf %21, %23 : vector<64x8xf32>
    %c0_15 = arith.constant 0 : index
    %c0_16 = arith.constant 0 : index
    %25 = vector.load %arg6[%c0_15, %c0_16] : memref<64x8xf32, #tpu.memory_space<vmem>>, vector<64x8xf32>
    tpu.vector_store %arg6[%c0_15, %c0_16], %24 {strides = array<i32>} : memref<64x8xf32, #tpu.memory_space<vmem>>, vector<64x8xf32>,
    return
  }
  func.func @transform_0(%arg0: i32) -> (i32, i32) {
    %c0_i32 = arith.constant 0 : i32
    %c0_i32_0 = arith.constant 0 : i32
    return %arg0, %c0_i32 : i32, i32
  }
  func.func @transform_1(%arg0: i32) -> (i32, i32) {
    %c0_i32 = arith.constant 0 : i32
    %c0_i32_0 = arith.constant 0 : i32
    %c0_i32_1 = arith.constant 0 : i32
    return %c0_i32, %c0_i32_0 : i32, i32
  }
  func.func @transform_2(%arg0: i32) -> (i32, i32) {
    %c0_i32 = arith.constant 0 : i32
    %c0_i32_0 = arith.constant 0 : i32
    %c0_i32_1 = arith.constant 0 : i32
    return %c0_i32, %c0_i32_0 : i32, i32
  }
  func.func @transform_3(%arg0: i32) -> (i32, i32) {
    %c0_i32 = arith.constant 0 : i32
    %c0_i32_0 = arith.constant 0 : i32
    %c0_i32_1 = arith.constant 0 : i32
    return %c0_i32, %c0_i32_0 : i32, i32
  }
  func.func @transform_4(%arg0: i32) -> (i32, i32) {
    %c0_i32 = arith.constant 0 : i32
    %c0_i32_0 = arith.constant 0 : i32
    %c0_i32_1 = arith.constant 0 : i32
    return %c0_i32, %c0_i32_0 : i32, i32
  }
  func.func @transform_5(%arg0: i32) -> (i32, i32) {
    %c0_i32 = arith.constant 0 : i32
    %c0_i32_0 = arith.constant 0 : i32
    return %arg0, %c0_i32 : i32, i32
  }
}

</mosaic_0001>

<bundles_post_ra>
// kernel: tpu_custom_call.1
= control target key start
LH: loop header
LB: loop body
LE: loop exit
PB: predicated region body
PF: predicated region fallthrough
CT: control target
= control target key end

     0   :  { %s837_s18 = smov 0   ;;  %s949_s0 = inlined_call_operand.vmem [shape: f32[128,32], index: 0, kind: input, shape index: {}]   ;;  %s950_s1 = inlined_call_operand.vmem [shape: f32[32,8], index: 1, kind: input, shape index: {}]   ;;  %s951_s2 = inlined_call_operand.vmem [shape: f32[32,1], index: 2, kind: input, shape index: {}]   ;;  %s952_s3 = inlined_call_operand.vmem [shape: f32[1,8], index: 3, kind: input, shape index: {}]   ;;  %s953_s4 = inlined_call_operand.vmem [shape: f32[1,8], index: 4, kind: input, shape index: {}]   ;;  %s954_s5 = inlined_call_operand.vmem [shape: f32[128,8], index: 5, kind: output, shape index: {}]  }
   0x1 LB: > { %s721_s19 = sadd.s32 4294967295, %s804_s18   ;;  %p725_p0 = scmp.ge.s32.totalorder %s804_s18, 1  ;;  %s804_s18 = sphi %s837_s18, %s15_s18  }
   0x2   : > { %p188_p1 = scmp.lt.s32.totalorder %s804_s18, 3 }
   0x4   : > { %p189_p2 = pnand %p725_p0, %p188_p1 }
   0x5   : > { %s726_s26 = sshll.u32 (!%p189_p2), %s721_s19, 3 }
   0x6   : > { %192 = sbr.rel (%p189_p2) target bundleno = 338 (0x152), region = 40  ;;  %p217_p3 = scmp.lt.s32.totalorder (!%p189_p2), %s726_s26, 15 }
   0xb   : > { %v239_v0 = vld [vmem:[%s950_s1 + $0x18] sm:$0xff]  ;;  %v238_v2 = vld [vmem:[%s950_s1 + $0x10] sm:$0xff]  ;;  %v237_v4 = vld [vmem:[%s950_s1 + $0x8] sm:$0xff]  ;;  %s956_s26 = smov (!%p217_p3, %s726_s26), 15  ;;  %vm240_vm0 = vcmask 261120   ;;  %v806_v24 = vmov 0  }
   0xc   : > { %v309_v1 = vld [vmem:[%s951_s2 + $0x18] sm:$0xff]  ;;  %756 = vmatpush.msra.mxu3 %v239_v0  ;;  %v308_v3 = vld [vmem:[%s951_s2 + $0x10] sm:$0xff]  ;;  %v307_v5 = vld [vmem:[%s951_s2 + $0x8] sm:$0xff]  ;;  %277 = vmatpush.msra.mxu0 %v239_v0  ;;  %s727_s12 = sshll.u32 %s956_s26, 3 }
   0xd   : > { %322 = vmatpush.msra.mxu1 %v309_v1  ;;  %395 = vmatpush.msra.mxu2 %v309_v1  ;;  %v236_v6 = vld [vmem:[%s950_s1] sm:$0xff]  ;;  %s877_s15 = scalar_lea.vmem %s949_s0, %s727_s12  ;;  %s926_s23 = scalar_lea.vmem %s954_s5, %s727_s12 }
   0xe   : > { %757 = vmatpush.msra.mxu3 %v238_v2  ;;  %v306_v7 = vld [vmem:[%s951_s2] sm:$0xff]  ;;  %278 = vmatpush.msra.mxu0 %v238_v2  ;;  %v234_v8 = vld [vmem:[%s877_s15 + $0x30] sm:$0xff]  ;;  %v229_v11 = vld [vmem:[%s877_s15 + $0x8] sm:$0xff] }
   0xf   : > { %323 = vmatpush.msra.mxu1 %v308_v3  ;;  %396 = vmatpush.msra.mxu2 %v308_v3  ;;  %v228_v9 = vld [vmem:[%s877_s15] sm:$0xff]  ;;  %v235_v12 = vld [vmem:[%s877_s15 + $0x38] sm:$0xff]  ;;  %v352_v13 = vmul.f32 %v229_v11, %v229_v11  ;;  %v230_v14 = vld [vmem:[%s877_s15 + $0x10] sm:$0xff]  ;;  %v357_v19 = vmul.f32 %v234_v8, %v234_v8 }
  0x10   : > { %758 = vmatpush.msra.mxu3 %v237_v4  ;;  %279 = vmatpush.msra.mxu0 %v237_v4  ;;  %v351_v10 = vmul.f32 %v228_v9, %v228_v9  ;;  %v353_v15 = vmul.f32 %v230_v14, %v230_v14  ;;  %v231_v16 = vld [vmem:[%s877_s15 + $0x18] sm:$0xff]  ;;  %v232_v18 = vld [vmem:[%s877_s15 + $0x20] sm:$0xff]  ;;  %v233_v21 = vld [vmem:[%s877_s15 + $0x28] sm:$0xff]  ;;  %v358_v22 = vmul.f32 %v235_v12, %v235_v12 }
  0x11   : > { %324 = vmatpush.msra.mxu1 %v307_v5  ;;  %397 = vmatpush.msra.mxu2 %v307_v5  ;;  %v354_v17 = vmul.f32 %v231_v16, %v231_v16  ;;  %v355_v20 = vmul.f32 %v232_v18, %v232_v18  ;;  %v356_v23 = vmul.f32 %v233_v21, %v233_v21 }
  0x12   : > { %759 = vmatpush.msra.mxu3 %v236_v6  ;;  %280 = vmatpush.msra.mxu0 %v236_v6 }
  0x13   : > { %325 = vmatpush.msra.mxu1 %v306_v7  ;;  %736 = vmatmul.msk.f32.vlgmr.msra.gmra.mxu3 %vm240_vm0, %v234_v8 }
  0x14   : > { %738 = vmatmul.msk.f32.vlgmr.msra.gmra.mxu1 %vm240_vm0, %v228_v9  ;;  %398 = vmatpush.msra.mxu2 %v306_v7 }
  0x15   : > { %760 = vmatpush.msrb.mxu3 %v309_v1  ;;  %746 = vmatmul.msk.f32.vlgmr.msra.gmra.mxu2 %vm240_vm0, %v351_v10 }
  0x16   : > { %730 = vmatmul.msk.f32.vlgmr.msra.gmra.mxu0 %vm240_vm0, %v228_v9  ;;  %777 = vset.pattern.permute.xlu0 %v806_v24 }
  0x17   : > { %761 = vmatpush.msrb.mxu3 %v308_v3  ;;  %778 = vset.pattern.permute.xlu1 %v806_v24 }
  0x18   : > { %779 = vset.pattern.permute.xlu2 %v806_v24 }
  0x19   : > { %762 = vmatpush.msrb.mxu3 %v307_v5 }
  0x1b   : > { %763 = vmatpush.msrb.mxu3 %v306_v7 }
  0x1c   : > { %737 = vmatmul.msk.f32.gmra.mxu3 %vm240_vm0, %v235_v12  ;;  %739 = vmatmul.msk.f32.gmra.mxu1 %vm240_vm0, %v229_v11 }
  0x1d   : > { %764 = vmatpush.msra.mxu3 %v309_v1  ;;  %747 = vmatmul.msk.f32.gmra.mxu2 %vm240_vm0, %v352_v13 }
  0x1e   : > { %731 = vmatmul.msk.f32.gmra.mxu0 %vm240_vm0, %v229_v11 }
  0x1f   : > { %765 = vmatpush.msra.mxu3 %v308_v3 }
  0x21   : > { %766 = vmatpush.msra.mxu3 %v307_v5 }
  0x23   : > { %767 = vmatpush.msra.mxu3 %v306_v7 }
  0x24   : > { %740 = vmatmul.msk.f32.gmra.mxu1 %vm240_vm0, %v230_v14  ;;  %744 = vmatmul.msk.f32.vlgmr.msrb.gmra.mxu3 %vm240_vm0, %v234_v8 }
  0x25   : > { %748 = vmatmul.msk.f32.gmra.mxu2 %vm240_vm0, %v353_v15 }
  0x26   : > { %732 = vmatmul.msk.f32.gmra.mxu0 %vm240_vm0, %v230_v14 }
  0x2c   : > { %741 = vmatmul.msk.f32.gmra.mxu1 %vm240_vm0, %v231_v16  ;;  %745 = vmatmul.msk.f32.gmra.mxu3 %vm240_vm0, %v235_v12 }
  0x2d   : > { %749 = vmatmul.msk.f32.gmra.mxu2 %vm240_vm0, %v354_v17 }
  0x2e   : > { %733 = vmatmul.msk.f32.gmra.mxu0 %vm240_vm0, %v231_v16 }
  0x34   : > { %742 = vmatmul.msk.f32.gmra.mxu1 %vm240_vm0, %v232_v18  ;;  %752 = vmatmul.msk.f32.vlgmr.msra.gmra.mxu3 %vm240_vm0, %v357_v19 }
  0x35   : > { %750 = vmatmul.msk.f32.gmra.mxu2 %vm240_vm0, %v355_v20 }
  0x36   : > { %734 = vmatmul.msk.f32.gmra.mxu0 %vm240_vm0, %v232_v18 }
  0x3c   : > { %753 = vmatmul.msk.f32.gmra.mxu3 %vm240_vm0, %v358_v22  ;;  %743 = vmatmul.msk.f32.gmra.mxu1 %vm240_vm0, %v233_v21 }
  0x3d   : > { %751 = vmatmul.msk.f32.gmra.mxu2 %vm240_vm0, %v356_v23 }
  0x3e   : > { %735 = vmatmul.msk.f32.gmra.mxu0 %vm240_vm0, %v233_v21 }
  0x91   : > { %v327_v25 = vpop.f32.mrf.mxu1 }
  0x92   : > { %539 = vperm.xlu0 %777, %v327_v25   ;;  %v424_v26 = vmul.f32 %v327_v25, %v327_v25 }
  0x96   : > { %v911_v27 = vpop.f32.mrf.mxu3 }
  0x98   : > { %v400_v29 = vpop.f32.mrf.mxu2 }
  0x99   : > { %v330_v28 = vpop.f32.mrf.mxu1  ;;  %v432_v30 = vsub.f32 %v400_v29, %v424_v26 }
  0x9a   : > { %544 = vperm.xlu0 %777, %v330_v28   ;;  %v425_v32 = vmul.f32 %v330_v28, %v330_v28 }
  0x9b   : > { %v440_v31 = vmax.f32 %v432_v30, 0.0 }
  0x9d   : > { %v448_v33 = vadd.f32 1e-05, %v440_v31 }
  0x9f   : > { %v913_v34 = vpop.f32.mrf.mxu3  ;;  %782 = vrsqrt.f32 %v448_v33  ;;  %vm462_vm3 = vweird.f32 %v448_v33 }
  0xa0   : > { %v403_v36 = vpop.f32.mrf.mxu2 }
  0xa1   : > { %v333_v35 = vpop.f32.mrf.mxu1  ;;  %v433_v37 = vsub.f32 %v403_v36, %v425_v32 }
  0xa2   : > { %549 = vperm.xlu1 %778, %v333_v35   ;;  %v426_v40 = vmul.f32 %v333_v35, %v333_v35 }
  0xa3   : > { %v441_v38 = vmax.f32 %v433_v37, 0.0 }
  0xa5   : > { %v783_v39 = vpop.eup %782  ;;  %v449_v41 = vadd.f32 1e-05, %v441_v38 }
  0xa6   : > { %v457_v42 = vmul.f32 %v783_v39, %v448_v33  ;;  %vm463_vm1 = vweird.f32 %v783_v39 }
  0xa7   : > { %v345_v43 = vpop.f32.mrf.mxu3  ;;  %784 = vrsqrt.f32 %v449_v41  ;;  %vm472_vm4 = vweird.f32 %v449_v41  ;;  %vm464_vm5 = vmor %vm462_vm3, %vm463_vm1 }
  0xa8   : > { %569 = vperm.xlu0 %777, %v345_v43   ;;  %v458_v44 = vmul.f32 %v783_v39, %v457_v42  ;;  %v406_v46 = vpop.f32.mrf.mxu2  ;;  %v430_v1 = vmul.f32 %v345_v43, %v345_v43 }
  0xa9   : > { %v336_v45 = vpop.f32.mrf.mxu1  ;;  %v434_v47 = vsub.f32 %v406_v46, %v426_v40 }
  0xaa   : > { %554 = vperm.xlu1 %778, %v336_v45   ;;  %v459_v49 = vmul.f32 0.5, %v458_v44  ;;  %v427_v51 = vmul.f32 %v336_v45, %v336_v45 }
  0xab   : > { %v442_v48 = vmax.f32 %v434_v47, 0.0 }
  0xac   : > { %v460_v58 = vsub.f32 1.5, %v459_v49 }
  0xad   : > { %v785_v50 = vpop.eup %784  ;;  %v450_v52 = vadd.f32 1e-05, %v442_v48 }
  0xae   : > { %v467_v53 = vmul.f32 %v785_v50, %v449_v41  ;;  %vm473_vm2 = vweird.f32 %v785_v50  ;;  %v461_v63 = vmul.f32 %v783_v39, %v460_v58 }
  0xaf   : > { %v348_v54 = vpop.f32.mrf.mxu3  ;;  %786 = vrsqrt.f32 %v450_v52  ;;  %vm474_vm6 = vmor %vm472_vm4, %vm473_vm2  ;;  %vm482_vm8 = vweird.f32 %v450_v52 }
  0xb0   : > { %v468_v55 = vmul.f32 %v785_v50, %v467_v53  ;;  %v409_v57 = vpop.f32.mrf.mxu2  ;;  %v465_v11 = vsel %vm464_vm5, %v783_v39, %v461_v63  ;;  %v431_v20 = vmul.f32 %v348_v54, %v348_v54 }
  0xb1   : > { %v339_v56 = vpop.f32.mrf.mxu1  ;;  %v435_v59 = vsub.f32 %v409_v57, %v427_v51 }
  0xb2   : > { %574 = vperm.xlu1 %778, %v348_v54   ;;  %559 = vperm.xlu2 %779, %v339_v56   ;;  %v469_v60 = vmul.f32 0.5, %v468_v55  ;;  %v428_v2 = vmul.f32 %v339_v56, %v339_v56 }
  0xb3   : > { %v443_v61 = vmax.f32 %v435_v59, 0.0 }
  0xb4   : > { %v470_v62 = vsub.f32 1.5, %v469_v60 }
  0xb5   : > { %v787_v0 = vpop.eup %786  ;;  %v451_v3 = vadd.f32 1e-05, %v443_v61 }
  0xb6   : > { %v477_v4 = vmul.f32 %v787_v0, %v450_v52  ;;  %v471_v6 = vmul.f32 %v785_v50, %v470_v62  ;;  %vm483_vm7 = vweird.f32 %v787_v0 }
  0xb7   : > { %v418_v5 = vpop.f32.mrf.mxu3  ;;  %788 = vrsqrt.f32 %v451_v3  ;;  %vm484_vm9 = vmor %vm482_vm8, %vm483_vm7  ;;  %vm492_vm11 = vweird.f32 %v451_v3 }
  0xb8   : > { %v438_v7 = vsub.f32 %v418_v5, %v430_v1  ;;  %v478_v8 = vmul.f32 %v787_v0, %v477_v4  ;;  %v412_v9 = vpop.f32.mrf.mxu2  ;;  %v475_v10 = vsel %vm474_vm6, %v785_v50, %v471_v6  ;;  %v282_v5 = vpop.f32.mrf.mxu0 }
  0xb9   : > { %v436_v13 = vsub.f32 %v412_v9, %v428_v2  ;;  %603 = vperm.xlu0 %777, %v475_v10   ;;  %v342_v15 = vpop.f32.mrf.mxu1 }
  0xba   : > { %v446_v12 = vmax.f32 %v438_v7, 0.0  ;;  %598 = vperm.xlu2 %779, %v465_v11   ;;  %v479_v14 = vmul.f32 0.5, %v478_v8  ;;  %v429_v22 = vmul.f32 %v342_v15, %v342_v15  ;;  %v780_v7 = vld [vmem:[%s952_s3] ss:$0 sm:$0xff] }
  0xbb   : > { %v444_v17 = vmax.f32 %v436_v13, 0.0  ;;  %v781_v11 = vld [vmem:[%s953_s4] ss:$0 sm:$0xff] }
  0xbc   : > { %v454_v16 = vadd.f32 1e-05, %v446_v12  ;;  %v480_v18 = vsub.f32 1.5, %v479_v14 }
  0xbd   : > { %v789_v19 = vpop.eup %788  ;;  %v452_v21 = vadd.f32 1e-05, %v444_v17 }
  0xbe   : > { %790 = vrsqrt.f32 %v454_v16  ;;  %v487_v23 = vmul.f32 %v789_v19, %v451_v3  ;;  %v481_v25 = vmul.f32 %v787_v0, %v480_v18  ;;  %vm493_vm10 = vweird.f32 %v789_v19 }
  0xbf   : > { %v421_v24 = vpop.f32.mrf.mxu3  ;;  %792 = vrsqrt.f32 %v452_v21  ;;  %vm494_vm12 = vmor %vm492_vm11, %vm493_vm10  ;;  %vm522_vm15 = vweird.f32 %v454_v16  ;;  %vm502_vm0 = vweird.f32 %v452_v21 }
  0xc0   : > { %v439_v26 = vsub.f32 %v421_v24, %v431_v20  ;;  %v488_v28 = vmul.f32 %v789_v19, %v487_v23  ;;  %v415_v29 = vpop.f32.mrf.mxu2  ;;  %v485_v30 = vsel %vm484_vm9, %v787_v0, %v481_v25  ;;  %v285_v6 = vpop.f32.mrf.mxu0  ;;  %vm656_vm9 = vcmask 64512  }
  0xc1   : > { %v437_v32 = vsub.f32 %v415_v29, %v429_v22  ;;  %608 = vperm.xlu1 %778, %v485_v30  }
  0xc2   : > { %v447_v31 = vmax.f32 %v439_v26, 0.0  ;;  %564 = vperm.xlu2 %779, %v342_v15   ;;  %v489_v33 = vmul.f32 0.5, %v488_v28 }
  0xc3   : > { %v445_v37 = vmax.f32 %v437_v32, 0.0 }
  0xc4   : > { %v791_v35 = vpop.eup %790  ;;  %v455_v36 = vadd.f32 1e-05, %v447_v31  ;;  %v490_v39 = vsub.f32 1.5, %v489_v33 }
  0xc5   : > { %v517_v38 = vmul.f32 %v791_v35, %v454_v16  ;;  %v793_v40 = vpop.eup %792  ;;  %v453_v41 = vadd.f32 1e-05, %v445_v37  ;;  %vm523_vm13 = vweird.f32 %v791_v35 }
  0xc6   : > { %794 = vrsqrt.f32 %v455_v36  ;;  %v497_v43 = vmul.f32 %v793_v40, %v452_v21  ;;  %v491_v44 = vmul.f32 %v789_v19, %v490_v39  ;;  %vm503_vm14 = vweird.f32 %v793_v40  ;;  %vm524_vm1 = vmor %vm522_vm15, %vm523_vm13 }
  0xc7   : > { %v518_v42 = vmul.f32 %v791_v35, %v517_v38  ;;  %796 = vrsqrt.f32 %v453_v41  ;;  %vm504_vm2 = vmor %vm502_vm0, %vm503_vm14  ;;  %vm532_vm5 = vweird.f32 %v455_v36  ;;  %vm512_vm7 = vweird.f32 %v453_v41 }
  0xc8   : > { %v498_v46 = vmul.f32 %v793_v40, %v497_v43  ;;  %v495_v47 = vsel %vm494_vm12, %v789_v19, %v491_v44  ;;  %v288_v16 = vpop.f32.mrf.mxu0 }
  0xc9   : > { %v519_v45 = vmul.f32 0.5, %v518_v42 }
  0xca   : > { %613 = vperm.xlu2 %779, %v495_v47   ;;  %v499_v48 = vmul.f32 0.5, %v498_v46 }
  0xcb   : > { %v520_v49 = vsub.f32 1.5, %v519_v45 }
  0xcc   : > { %v795_v50 = vpop.eup %794  ;;  %v500_v52 = vsub.f32 1.5, %v499_v48 }
  0xcd   : > { %v527_v51 = vmul.f32 %v795_v50, %v455_v36  ;;  %v521_v53 = vmul.f32 %v791_v35, %v520_v49  ;;  %v797_v54 = vpop.eup %796  ;;  %vm533_vm3 = vweird.f32 %v795_v50 }
  0xce   : > { %v507_v56 = vmul.f32 %v797_v54, %v453_v41  ;;  %v501_v57 = vmul.f32 %v793_v40, %v500_v52  ;;  %vm513_vm4 = vweird.f32 %v797_v54  ;;  %vm534_vm6 = vmor %vm532_vm5, %vm533_vm3 }
  0xcf   : > { %v528_v55 = vmul.f32 %v795_v50, %v527_v51  ;;  %v525_v61 = vsel %vm524_vm1, %v791_v35, %v521_v53  ;;  %vm514_vm8 = vmor %vm512_vm7, %vm513_vm4 }
  0xd0   : > { %v508_v59 = vmul.f32 %v797_v54, %v507_v56  ;;  %v505_v60 = vsel %vm504_vm2, %v793_v40, %v501_v57  ;;  %v291_v22 = vpop.f32.mrf.mxu0 }
  0xd1   : > { %v529_v58 = vmul.f32 0.5, %v528_v55  ;;  %618 = vperm.xlu0 %777, %v505_v60  }
  0xd2   : > { %628 = vperm.xlu2 %779, %v525_v61   ;;  %v509_v62 = vmul.f32 0.5, %v508_v59 }
  0xd3   : > { %v530_v63 = vsub.f32 1.5, %v529_v58 }
  0xd4   : > { %v510_v1 = vsub.f32 1.5, %v509_v62 }
  0xd5   : > { %v531_v0 = vmul.f32 %v795_v50, %v530_v63 }
  0xd6   : > { %v511_v2 = vmul.f32 %v797_v54, %v510_v1 }
  0xd7   : > { %v535_v3 = vsel %vm534_vm6, %v795_v50, %v531_v0 }
  0xd8   : > { %v515_v4 = vsel %vm514_vm8, %v797_v54, %v511_v2 }
  0xd9   : > { %633 = vperm.xlu0 %777, %v535_v3   ;;  %623 = vperm.xlu1 %778, %v515_v4  }
 0x104   : > { %v540_v8 = vpop.permute.xlu0 %539 }
 0x105   : > { %v580_v10 = vmul.f32 %v780_v7, %v540_v8 }
 0x107   : > { %v588_v12 = vsub.f32 %v282_v5, %v580_v10 }
 0x10c   : > { %v560_v9 = vpop.permute.xlu2 %559  ;;  %v545_v18 = vpop.permute.xlu0 %544 }
 0x10d   : > { %v581_v28 = vmul.f32 %v780_v7, %v545_v18  ;;  %v584_v46 = vmul.f32 %v780_v7, %v560_v9 }
 0x10f   : > { %v589_v32 = vsub.f32 %v285_v6, %v581_v28 }
 0x114   : > { %v550_v13 = vpop.permute.xlu1 %549  ;;  %v599_v14 = vpop.permute.xlu2 %598 }
 0x115   : > { %v636_v15 = vmul.f32 %v599_v14, %v588_v12  ;;  %v582_v39 = vmul.f32 %v780_v7, %v550_v13 }
 0x117   : > { %v648_v17 = vadd.f32 %v781_v11, %v636_v15  ;;  %v590_v42 = vsub.f32 %v288_v16, %v582_v39 }
 0x119   : > { %657 = vst.msk [vmem:[%s926_s23] sm:$0xff] %vm656_vm9, %v648_v17 }
 0x11a   : > { %v570_v24 = vpop.permute.xlu0 %569 }
 0x11b   : > { %v586_v29 = vmul.f32 %v780_v7, %v570_v24 }
 0x11c   : > { %v555_v19 = vpop.permute.xlu1 %554  ;;  %v565_v20 = vpop.permute.xlu2 %564 }
 0x11d   : > { %v583_v21 = vmul.f32 %v780_v7, %v555_v19  ;;  %v594_v33 = vsub.f32 %v911_v27, %v586_v29  ;;  %v294_v27 = vpop.f32.mrf.mxu0  ;;  %v585_v50 = vmul.f32 %v780_v7, %v565_v20 }
 0x11e   : > { %v592_v47 = vsub.f32 %v294_v27, %v584_v46 }
 0x11f   : > { %v591_v23 = vsub.f32 %v291_v22, %v583_v21 }
 0x124   : > { %v614_v25 = vpop.permute.xlu2 %613  ;;  %v575_v31 = vpop.permute.xlu1 %574 }
 0x125   : > { %v639_v26 = vmul.f32 %v614_v25, %v591_v23  ;;  %v587_v51 = vmul.f32 %v780_v7, %v575_v31  ;;  %v297_v53 = vpop.f32.mrf.mxu0 }
 0x126   : > { %v593_v54 = vsub.f32 %v297_v53, %v585_v50 }
 0x127   : > { %v651_v30 = vadd.f32 %v781_v11, %v639_v26  ;;  %v595_v55 = vsub.f32 %v913_v34, %v587_v51 }
 0x129   : > { %660 = vst.msk [vmem:[%s926_s23 + $0x18] sm:$0xff] %vm656_vm9, %v651_v30 }
 0x12b   : > { %v604_v35 = vpop.permute.xlu0 %603 }
 0x12c   : > { %v629_v36 = vpop.permute.xlu2 %628  ;;  %v637_v37 = vmul.f32 %v604_v35, %v589_v32 }
 0x12d   : > { %v642_v38 = vmul.f32 %v629_v36, %v594_v33 }
 0x12e   : > { %v649_v40 = vadd.f32 %v781_v11, %v637_v37 }
 0x12f   : > { %v654_v41 = vadd.f32 %v781_v11, %v642_v38 }
 0x130   : > { %658 = vst.msk [vmem:[%s926_s23 + $0x8] sm:$0xff] %vm656_vm9, %v649_v40 }
 0x131   : > { %663 = vst.msk [vmem:[%s926_s23 + $0x30] sm:$0xff] %vm656_vm9, %v654_v41 }
 0x133   : > { %v609_v43 = vpop.permute.xlu1 %608 }
 0x134   : > { %v638_v44 = vmul.f32 %v609_v43, %v590_v42 }
 0x136   : > { %v650_v45 = vadd.f32 %v781_v11, %v638_v44 }
 0x138   : > { %659 = vst.msk [vmem:[%s926_s23 + $0x10] sm:$0xff] %vm656_vm9, %v650_v45 }
 0x143   : > { %v619_v48 = vpop.permute.xlu0 %618 }
 0x144   : > { %v640_v49 = vmul.f32 %v619_v48, %v592_v47 }
 0x146   : > { %v652_v52 = vadd.f32 %v781_v11, %v640_v49 }
 0x148   : > { %661 = vst.msk [vmem:[%s926_s23 + $0x20] sm:$0xff] %vm656_vm9, %v652_v52 }
 0x14b   : > { %v634_v56 = vpop.permute.xlu0 %633  ;;  %v624_v57 = vpop.permute.xlu1 %623 }
 0x14c   : > { %v643_v58 = vmul.f32 %v634_v56, %v595_v55  ;;  %v641_v59 = vmul.f32 %v624_v57, %v593_v54 }
 0x14e   : > { %v655_v60 = vadd.f32 %v781_v11, %v643_v58  ;;  %v653_v61 = vadd.f32 %v781_v11, %v641_v59 }
 0x150   : > { %664 = vst.msk [vmem:[%s926_s23 + $0x38] sm:$0xff] %vm656_vm9, %v655_v60 }
 0x151   : > { %662 = vst.msk [vmem:[%s926_s23 + $0x28] sm:$0xff] %vm656_vm9, %v653_v61 }
 0x152 PF: > { %s15_s18 = sadd.s32 1, %s804_s18  }
 0x153   : > { %p12_p4 = scmp.ge.s32.totalorder %s15_s18, 4  }
 0x155   :  { %14 = sbr.rel (!%p12_p4) target bundleno = 1 (0x1), region = 70 }

</bundles_post_ra>
